<compile_context>
chip_gen: v7x
topology: tpu7x:2x2x1
jax: 0.10.0
libtpu: 0.0.40
codegen_flags: <defaults>
</compile_context>

<pallas_src>
import functools

import jax
import jax.numpy as jnp
from jax.experimental import pallas as pl
from jax.experimental.pallas import tpu as pltpu

_LANE = 128      # lane width (last dim)
_SUBLANE = 8     # f32 sublane count (second-to-last dim)


def _round_up(n, m):
    return ((n + m - 1) // m) * m


def _choose_block_batch(batch):
    """Batch tile heuristic.

    * padded batch < 256 rows  -> single grid step (small, latency-sensitive head)
    * medium batches           -> ~4 grid steps (2 per TensorCore on v7x, so
                                  BlockSpec double-buffering still overlaps)
    * very large batches       -> 512-row tiles (~85% of HBM roofline measured)
    """
    bp = _round_up(batch, _SUBLANE)
    if bp < 256:
        return bp
    if bp >= 2048:
        return 512
    return max(_round_up(-(-bp // 4), _SUBLANE), 64)


def _feature_tile(dim_p, cap=512):
    """Largest multiple-of-128 tile <= cap that divides the padded feature dim."""
    t = min(cap, dim_p)
    while dim_p % t:
        t -= _LANE
    return t


def _vmem_budget_bytes(headroom=16 << 20):
    """Usable VMEM for this kernel: chip capacity minus compiler headroom."""
    try:
        cap = int(pltpu.get_tpu_info().vmem_capacity_bytes)
    except Exception:
        cap = 64 << 20   # conservative default (v7x per-TensorCore VMEM)
    return max(cap - headroom, 32 << 20)


# ----------------------------- fused whole-MLP kernel -----------------------------


def _mlp_kernel(x_ref, *refs):
    """Fused MLP kernel.

    refs = (w0, b0, w1, b1, ..., w_{L-1}, b_{L-1}, out_ref)
    Weights may be bf16 (activations cast to the weight dtype just before each
    MXU dot); accumulation, bias-add and ReLU run in f32 (v5e has no bf16 VPU).
    ReLU after every layer except the last (matches the PyTorch Sequential).
    """
    out_ref = refs[-1]
    param_refs = refs[:-1]
    n_layers = len(param_refs) // 2

    h = x_ref[...]
    for layer in range(n_layers):
        w = param_refs[2 * layer][...]
        b = param_refs[2 * layer + 1][...]
        acc = jnp.dot(h.astype(w.dtype), w, preferred_element_type=jnp.float32)
        acc = acc + b.astype(jnp.float32)
        if layer < n_layers - 1:
            acc = jnp.maximum(acc, 0.0)   # ReLU (f32 VPU path)
        h = acc
    out_ref[...] = h.astype(out_ref.dtype)


# ------------------------- layer-wise tiled fallback kernel ------------------------


def _linear_kernel(x_ref, w_ref, b_ref, o_ref, acc_ref, *, apply_relu):
    k = pl.program_id(2)

    @pl.when(k == 0)
    def _():
        acc_ref[...] = jnp.zeros_like(acc_ref)

    acc_ref[...] += jnp.dot(x_ref[...].astype(w_ref.dtype), w_ref[...],
                            preferred_element_type=jnp.float32)

    @pl.when(k == pl.num_programs(2) - 1)
    def _():
        r = acc_ref[...] + b_ref[...].astype(jnp.float32)
        if apply_relu:
            r = jnp.maximum(r, 0.0)
        o_ref[...] = r.astype(o_ref.dtype)


def _tiled_linear(x, w, b, *, apply_relu, tm, tn, tk, out_dtype, vmem_limit):
    M, K = x.shape
    _, N = w.shape
    kernel = functools.partial(_linear_kernel, apply_relu=apply_relu)
    return pl.pallas_call(
        kernel,
        out_shape=jax.ShapeDtypeStruct((M, N), out_dtype),
        grid_spec=pltpu.PrefetchScalarGridSpec(
            num_scalar_prefetch=0,
            grid=(M // tm, N // tn, K // tk),
            in_specs=[pl.BlockSpec((tm, tk), lambda i, j, k: (i, k)),
                      pl.BlockSpec((tk, tn), lambda i, j, k: (k, j)),
                      pl.BlockSpec((1, tn), lambda i, j, k: (0, j))],
            out_specs=pl.BlockSpec((tm, tn), lambda i, j, k: (i, j)),
            scratch_shapes=[pltpu.VMEM((tm, tn), jnp.float32)],
        ),
        compiler_params=pltpu.CompilerParams(
            dimension_semantics=("parallel", "parallel", "arbitrary"),
            vmem_limit_bytes=vmem_limit,
        ),
    )(x, w, b)


# ----------------------------------- wrapper ---------------------------------------


def prepare_params(weights, biases, param_dtype=jnp.bfloat16):
    """One-time padding + cast of the parameters (hoisted out of the hot path).

    weights: list of (fan_in, fan_out) arrays (transpose of PyTorch layout)
    biases:  list of (fan_out,) or (1, fan_out) arrays
    Returns (params, dims_p): params = (w0, b0, w1, b1, ...) with lane-dense
    padded shapes; dims_p = padded feature dims (in, hid, ..., out).
    """
    dims = [weights[0].shape[0]] + [w.shape[1] for w in weights]
    dims_p = tuple(_round_up(d, _LANE) for d in dims)
    params = []
    for li, (w, b) in enumerate(zip(weights, biases)):
        w_p = jnp.pad(w.astype(param_dtype),
                      ((0, dims_p[li] - w.shape[0]),
                       (0, dims_p[li + 1] - w.shape[1])))
        b2 = jnp.reshape(b, (1, -1)).astype(jnp.float32)
        b_p = jnp.pad(b2, ((0, 0), (0, dims_p[li + 1] - b2.shape[1])))
        params.extend([w_p, b_p])
    return tuple(params), dims_p


def feed_forward_network(x, params, *, dims_p, out_size, block_batch=None,
                         single_buffer_params=True, force_layerwise=False):
    """Apply the MLP to x using padded params produced by prepare_params.

    x: (B, input_size).  Output: (B, out_size) in x.dtype.
    """
    batch, in_size = x.shape
    n_layers = len(params) // 2

    if block_batch is None:
        block_batch = _choose_block_batch(batch)
    assert block_batch % _SUBLANE == 0, "block_batch must be a multiple of 8"

    b_pad = _round_up(batch, block_batch)

    # Cast x to the weight compute dtype at the boundary (same rounding as the
    # in-kernel cast, but halves the input-tile DMA bytes when weights are bf16).
    comp_dtype = jnp.bfloat16 if params[0].dtype == jnp.bfloat16 else x.dtype
    x_p = jnp.pad(x, ((0, b_pad - batch),
                      (0, dims_p[0] - in_size))).astype(comp_dtype)

    budget = _vmem_budget_bytes()

    # Resident-VMEM estimate for the fully fused kernel.
    param_bufs = 1 if single_buffer_params else 2
    param_bytes = sum(p.size * p.dtype.itemsize for p in params)
    x_tile_bytes = block_batch * dims_p[0] * x_p.dtype.itemsize
    out_tile_bytes = block_batch * dims_p[-1] * jnp.dtype(x.dtype).itemsize
    act_bytes = block_batch * max(dims_p) * 4 * 2   # f32 acc + low-precision copy
    vmem_needed = (param_bufs * param_bytes + 2 * x_tile_bytes
                   + 2 * out_tile_bytes + 2 * act_bytes + (2 << 20))

    if force_layerwise or vmem_needed > budget:
        # -------- fallback: layer-by-layer K/N-tiled matmul (+bias/ReLU) --------
        vmem_limit = int(min(budget, 64 << 20))
        h = x_p
        for li in range(n_layers):
            w_p, b_p = params[2 * li], params[2 * li + 1]
            k_p, n_p = w_p.shape
            last = li == n_layers - 1
            h = _tiled_linear(
                h, w_p, b_p, apply_relu=not last,
                tm=block_batch, tn=_feature_tile(n_p), tk=_feature_tile(k_p),
                out_dtype=x.dtype if last else comp_dtype,
                vmem_limit=vmem_limit)
        out_p = h
    else:
        # --------------------------- fused whole-MLP path ------------------------
        grid = (b_pad // block_batch,)

        in_specs = [pl.BlockSpec((block_batch, dims_p[0]), lambda i: (i, 0))]
        for p in params:
            if single_buffer_params:
                # Constant block index -> second pipeline buffer is pure waste.
                in_specs.append(pl.BlockSpec(p.shape, lambda i: (0, 0),
                                             pipeline_mode=pl.Buffered(1)))
            else:
                in_specs.append(pl.BlockSpec(p.shape, lambda i: (0, 0)))
        out_specs = pl.BlockSpec((block_batch, dims_p[-1]), lambda i: (i, 0))

        vmem_limit = int(min(max(vmem_needed, 32 << 20), budget))
        flops = 2 * b_pad * sum(dims_p[i] * dims_p[i + 1] for i in range(n_layers))
        bytes_accessed = (x_p.size * x_p.dtype.itemsize
                          + b_pad * dims_p[-1] * jnp.dtype(x.dtype).itemsize
                          + param_bytes)
        cost = pl.CostEstimate(flops=flops, transcendentals=0,
                               bytes_accessed=bytes_accessed)

        out_p = pl.pallas_call(
            _mlp_kernel,
            out_shape=jax.ShapeDtypeStruct((b_pad, dims_p[-1]), x.dtype),
            grid_spec=pltpu.PrefetchScalarGridSpec(
                num_scalar_prefetch=0,
                grid=grid,
                in_specs=in_specs,
                out_specs=out_specs,
            ),
            compiler_params=pltpu.CompilerParams(
                dimension_semantics=("parallel",),
                vmem_limit_bytes=vmem_limit,
            ),
            cost_estimate=cost,
        )(x_p, *params)

    return out_p[:batch, :out_size]


# --------------------------------- test harness ------------------------------------


def init_params(key, input_size, hidden_size, output_size, n_layers=2, bias=True):
    """Deterministic synthetic parameter init (shapes mirror the PyTorch module)."""
    dims = [input_size] + [hidden_size] * (n_layers - 1) + [output_size]
    weights, biases = [], []
    for li in range(n_layers):
        key, wk, bk = jax.random.split(key, 3)
        fan_in, fan_out = dims[li], dims[li + 1]
        bound = 1.0 / jnp.sqrt(fan_in)
        w = jax.random.uniform(wk, (fan_in, fan_out), jnp.float32, -bound, bound)
        if bias:
            b = jax.random.uniform(bk, (1, fan_out), jnp.float32, -bound, bound)
        else:
            b = jnp.zeros((1, fan_out), jnp.float32)
        weights.append(w)
        biases.append(b)
    return weights, biases


def reference_mlp(x, weights, biases, param_dtype=jnp.bfloat16):
    """Pure-JAX reference applying the same bf16-weights / f32-accum recipe."""
    h = x
    for li, (w, b) in enumerate(zip(weights, biases)):
        h = jnp.dot(h.astype(param_dtype), w.astype(param_dtype),
                    preferred_element_type=jnp.float32) + b
        if li < len(weights) - 1:
            h = jnp.maximum(h, 0.0)
    return h.astype(x.dtype)


if __name__ == "__main__":
    # Small shapes consistent with the module: input=16, hidden=32, output=4,
    # n_layers=3 (one hidden->hidden layer exercised); batch=256 so the fused
    # path runs a 4-step batch grid (64-row tiles) and actually pipelines.
    input_size, hidden_size, output_size, n_layers = 16, 32, 4, 3
    batch = 256

    key = jax.random.PRNGKey(0)
    key, xk, pk = jax.random.split(key, 3)
    x = jax.random.normal(xk, (batch, input_size), jnp.float32)
    weights, biases = init_params(pk, input_size, hidden_size, output_size,
                                  n_layers=n_layers, bias=True)

    # One-time padding / bf16 cast, hoisted out of the per-call path.
    params, dims_p = prepare_params(weights, biases, param_dtype=jnp.bfloat16)

    def build(single_buffer, layerwise=False):
        return jax.jit(functools.partial(
            feed_forward_network, dims_p=dims_p, out_size=output_size,
            single_buffer_params=single_buffer, force_layerwise=layerwise))

    try:
        run = build(True)
        out = jax.block_until_ready(run(x, params))
    except Exception:
        # Fallback if single-buffered (pl.Buffered(1)) params fail to lower here.
        run = build(False)
        out = jax.block_until_ready(run(x, params))

    ref = reference_mlp(x, weights, biases)
    assert out.shape == (batch, output_size)
    assert jnp.allclose(out, ref, atol=2e-3, rtol=2e-3), "fused mismatch vs reference"

    # Also validate the large-model layer-wise fallback path on the same data.
    run_lw = build(True, layerwise=True)
    out_lw = jax.block_until_ready(run_lw(x, params))
    assert jnp.allclose(out_lw, ref, atol=2e-3, rtol=2e-3), "layerwise mismatch"

    print("KERNEL_OK")
</pallas_src>

<mosaic_0001>
module attributes {stable_mosaic.version = 11 : i64} {
  func.func @_mlp_kernel(%arg0: i32, %arg1: memref<64x128xbf16, #tpu.memory_space<vmem>>, %arg2: memref<128x128xbf16, #tpu.memory_space<vmem>>, %arg3: memref<1x128xf32, #tpu.memory_space<vmem>>, %arg4: memref<128x128xbf16, #tpu.memory_space<vmem>>, %arg5: memref<1x128xf32, #tpu.memory_space<vmem>>, %arg6: memref<128x128xbf16, #tpu.memory_space<vmem>>, %arg7: memref<1x128xf32, #tpu.memory_space<vmem>>, %arg8: memref<64x128xf32, #tpu.memory_space<vmem>>) attributes {dimension_semantics = [#tpu.dimension_semantics<parallel>], iteration_bounds = array<i64: 4>, scalar_prefetch = 0 : i64, scratch_operands = 0 : i64, tpu.core_type = #tpu.core_type<tc>, window_params = [{transform_indices = @transform_0, window_bounds = array<i64: 64, 128>}, {pipeline_mode = #tpu.pipeline_mode<synchronous>, transform_indices = @transform_1, window_bounds = array<i64: 128, 128>}, {pipeline_mode = #tpu.pipeline_mode<synchronous>, transform_indices = @transform_2, window_bounds = array<i64: 1, 128>}, {pipeline_mode = #tpu.pipeline_mode<synchronous>, transform_indices = @transform_3, window_bounds = array<i64: 128, 128>}, {pipeline_mode = #tpu.pipeline_mode<synchronous>, transform_indices = @transform_4, window_bounds = array<i64: 1, 128>}, {pipeline_mode = #tpu.pipeline_mode<synchronous>, transform_indices = @transform_5, window_bounds = array<i64: 128, 128>}, {pipeline_mode = #tpu.pipeline_mode<synchronous>, transform_indices = @transform_6, window_bounds = array<i64: 1, 128>}, {transform_indices = @transform_7, window_bounds = array<i64: 64, 128>}]} {
    %c0 = arith.constant 0 : index
    %c0_0 = arith.constant 0 : index
    %0 = vector.load %arg1[%c0, %c0_0] : memref<64x128xbf16, #tpu.memory_space<vmem>>, vector<64x128xbf16>
    %c0_1 = arith.constant 0 : index
    %c0_2 = arith.constant 0 : index
    %1 = vector.load %arg2[%c0_1, %c0_2] : memref<128x128xbf16, #tpu.memory_space<vmem>>, vector<128x128xbf16>
    %c0_3 = arith.constant 0 : index
    %c0_4 = arith.constant 0 : index
    %2 = vector.load %arg3[%c0_3, %c0_4] : memref<1x128xf32, #tpu.memory_space<vmem>>, vector<1x128xf32>
    %cst = arith.constant dense<0.000000e+00> : vector<64x128xf32>
    %3 = tpu.matmul %0, %1, %cst {dimension_numbers = #tpu.dot_dimension_numbers<[1], [0], [0], [1], [0, 0, 1, 1], [], []>} : vector<64x128xbf16>, vector<128x128xbf16>, vector<64x128xf32> -> vector<64x128xf32>
    %4 = vector.broadcast %2 : vector<1x128xf32> to vector<64x128xf32>
    %5 = arith.addf %3, %4 : vector<64x128xf32>
    %cst_5 = arith.constant 0.000000e+00 : f32
    %6 = vector.broadcast %cst_5 : f32 to vector<64x128xf32>
    %7 = arith.maximumf %5, %6 : vector<64x128xf32>
    %c0_6 = arith.constant 0 : index
    %c0_7 = arith.constant 0 : index
    %8 = vector.load %arg4[%c0_6, %c0_7] : memref<128x128xbf16, #tpu.memory_space<vmem>>, vector<128x128xbf16>
    %c0_8 = arith.constant 0 : index
    %c0_9 = arith.constant 0 : index
    %9 = vector.load %arg5[%c0_8, %c0_9] : memref<1x128xf32, #tpu.memory_space<vmem>>, vector<1x128xf32>
    %10 = arith.truncf %7 : vector<64x128xf32> to vector<64x128xbf16>
    %cst_10 = arith.constant dense<0.000000e+00> : vector<64x128xf32>
    %11 = tpu.matmul %10, %8, %cst_10 {dimension_numbers = #tpu.dot_dimension_numbers<[1], [0], [0], [1], [0, 0, 1, 1], [], []>} : vector<64x128xbf16>, vector<128x128xbf16>, vector<64x128xf32> -> vector<64x128xf32>
    %12 = vector.broadcast %9 : vector<1x128xf32> to vector<64x128xf32>
    %13 = arith.addf %11, %12 : vector<64x128xf32>
    %cst_11 = arith.constant 0.000000e+00 : f32
    %14 = vector.broadcast %cst_11 : f32 to vector<64x128xf32>
    %15 = arith.maximumf %13, %14 : vector<64x128xf32>
    %c0_12 = arith.constant 0 : index
    %c0_13 = arith.constant 0 : index
    %16 = vector.load %arg6[%c0_12, %c0_13] : memref<128x128xbf16, #tpu.memory_space<vmem>>, vector<128x128xbf16>
    %c0_14 = arith.constant 0 : index
    %c0_15 = arith.constant 0 : index
    %17 = vector.load %arg7[%c0_14, %c0_15] : memref<1x128xf32, #tpu.memory_space<vmem>>, vector<1x128xf32>
    %18 = arith.truncf %15 : vector<64x128xf32> to vector<64x128xbf16>
    %cst_16 = arith.constant dense<0.000000e+00> : vector<64x128xf32>
    %19 = tpu.matmul %18, %16, %cst_16 {dimension_numbers = #tpu.dot_dimension_numbers<[1], [0], [0], [1], [0, 0, 1, 1], [], []>} : vector<64x128xbf16>, vector<128x128xbf16>, vector<64x128xf32> -> vector<64x128xf32>
    %20 = vector.broadcast %17 : vector<1x128xf32> to vector<64x128xf32>
    %21 = arith.addf %19, %20 : vector<64x128xf32>
    %c0_17 = arith.constant 0 : index
    %c0_18 = arith.constant 0 : index
    %22 = vector.load %arg8[%c0_17, %c0_18] : memref<64x128xf32, #tpu.memory_space<vmem>>, vector<64x128xf32>
    tpu.vector_store %arg8[%c0_17, %c0_18], %21 {strides = array<i32>} : memref<64x128xf32, #tpu.memory_space<vmem>>, vector<64x128xf32>,
    return
  }
  func.func @transform_0(%arg0: i32) -> (i32, i32) {
    %c0_i32 = arith.constant 0 : i32
    %c0_i32_0 = arith.constant 0 : i32
    return %arg0, %c0_i32 : i32, i32
  }
  func.func @transform_1(%arg0: i32) -> (i32, i32) {
    %c0_i32 = arith.constant 0 : i32
    %c0_i32_0 = arith.constant 0 : i32
    %c0_i32_1 = arith.constant 0 : i32
    return %c0_i32, %c0_i32_0 : i32, i32
  }
  func.func @transform_2(%arg0: i32) -> (i32, i32) {
    %c0_i32 = arith.constant 0 : i32
    %c0_i32_0 = arith.constant 0 : i32
    %c0_i32_1 = arith.constant 0 : i32
    return %c0_i32, %c0_i32_0 : i32, i32
  }
  func.func @transform_3(%arg0: i32) -> (i32, i32) {
    %c0_i32 = arith.constant 0 : i32
    %c0_i32_0 = arith.constant 0 : i32
    %c0_i32_1 = arith.constant 0 : i32
    return %c0_i32, %c0_i32_0 : i32, i32
  }
  func.func @transform_4(%arg0: i32) -> (i32, i32) {
    %c0_i32 = arith.constant 0 : i32
    %c0_i32_0 = arith.constant 0 : i32
    %c0_i32_1 = arith.constant 0 : i32
    return %c0_i32, %c0_i32_0 : i32, i32
  }
  func.func @transform_5(%arg0: i32) -> (i32, i32) {
    %c0_i32 = arith.constant 0 : i32
    %c0_i32_0 = arith.constant 0 : i32
    %c0_i32_1 = arith.constant 0 : i32
    return %c0_i32, %c0_i32_0 : i32, i32
  }
  func.func @transform_6(%arg0: i32) -> (i32, i32) {
    %c0_i32 = arith.constant 0 : i32
    %c0_i32_0 = arith.constant 0 : i32
    %c0_i32_1 = arith.constant 0 : i32
    return %c0_i32, %c0_i32_0 : i32, i32
  }
  func.func @transform_7(%arg0: i32) -> (i32, i32) {
    %c0_i32 = arith.constant 0 : i32
    %c0_i32_0 = arith.constant 0 : i32
    return %arg0, %c0_i32 : i32, i32
  }
}

module attributes {stable_mosaic.version = 11 : i64} {
  func.func @_mlp_kernel(%arg0: i32, %arg1: memref<64x128xbf16, #tpu.memory_space<vmem>>, %arg2: memref<128x128xbf16, #tpu.memory_space<vmem>>, %arg3: memref<1x128xf32, #tpu.memory_space<vmem>>, %arg4: memref<128x128xbf16, #tpu.memory_space<vmem>>, %arg5: memref<1x128xf32, #tpu.memory_space<vmem>>, %arg6: memref<128x128xbf16, #tpu.memory_space<vmem>>, %arg7: memref<1x128xf32, #tpu.memory_space<vmem>>, %arg8: memref<64x128xf32, #tpu.memory_space<vmem>>) attributes {dimension_semantics = [#tpu.dimension_semantics<parallel>], iteration_bounds = array<i64: 4>, scalar_prefetch = 0 : i64, scratch_operands = 0 : i64, tpu.core_type = #tpu.core_type<tc>, window_params = [{transform_indices = @transform_0, window_bounds = array<i64: 64, 128>}, {pipeline_mode = #tpu.pipeline_mode<synchronous>, transform_indices = @transform_1, window_bounds = array<i64: 128, 128>}, {pipeline_mode = #tpu.pipeline_mode<synchronous>, transform_indices = @transform_2, window_bounds = array<i64: 1, 128>}, {pipeline_mode = #tpu.pipeline_mode<synchronous>, transform_indices = @transform_3, window_bounds = array<i64: 128, 128>}, {pipeline_mode = #tpu.pipeline_mode<synchronous>, transform_indices = @transform_4, window_bounds = array<i64: 1, 128>}, {pipeline_mode = #tpu.pipeline_mode<synchronous>, transform_indices = @transform_5, window_bounds = array<i64: 128, 128>}, {pipeline_mode = #tpu.pipeline_mode<synchronous>, transform_indices = @transform_6, window_bounds = array<i64: 1, 128>}, {transform_indices = @transform_7, window_bounds = array<i64: 64, 128>}]} {
    %c0 = arith.constant 0 : index
    %c0_0 = arith.constant 0 : index
    %0 = vector.load %arg1[%c0, %c0_0] : memref<64x128xbf16, #tpu.memory_space<vmem>>, vector<64x128xbf16>
    %c0_1 = arith.constant 0 : index
    %c0_2 = arith.constant 0 : index
    %1 = vector.load %arg2[%c0_1, %c0_2] : memref<128x128xbf16, #tpu.memory_space<vmem>>, vector<128x128xbf16>
    %c0_3 = arith.constant 0 : index
    %c0_4 = arith.constant 0 : index
    %2 = vector.load %arg3[%c0_3, %c0_4] : memref<1x128xf32, #tpu.memory_space<vmem>>, vector<1x128xf32>
    %cst = arith.constant dense<0.000000e+00> : vector<64x128xf32>
    %3 = tpu.matmul %0, %1, %cst {dimension_numbers = #tpu.dot_dimension_numbers<[1], [0], [0], [1], [0, 0, 1, 1], [], []>} : vector<64x128xbf16>, vector<128x128xbf16>, vector<64x128xf32> -> vector<64x128xf32>
    %4 = vector.broadcast %2 : vector<1x128xf32> to vector<64x128xf32>
    %5 = arith.addf %3, %4 : vector<64x128xf32>
    %cst_5 = arith.constant 0.000000e+00 : f32
    %6 = vector.broadcast %cst_5 : f32 to vector<64x128xf32>
    %7 = arith.maximumf %5, %6 : vector<64x128xf32>
    %c0_6 = arith.constant 0 : index
    %c0_7 = arith.constant 0 : index
    %8 = vector.load %arg4[%c0_6, %c0_7] : memref<128x128xbf16, #tpu.memory_space<vmem>>, vector<128x128xbf16>
    %c0_8 = arith.constant 0 : index
    %c0_9 = arith.constant 0 : index
    %9 = vector.load %arg5[%c0_8, %c0_9] : memref<1x128xf32, #tpu.memory_space<vmem>>, vector<1x128xf32>
    %10 = arith.truncf %7 : vector<64x128xf32> to vector<64x128xbf16>
    %cst_10 = arith.constant dense<0.000000e+00> : vector<64x128xf32>
    %11 = tpu.matmul %10, %8, %cst_10 {dimension_numbers = #tpu.dot_dimension_numbers<[1], [0], [0], [1], [0, 0, 1, 1], [], []>} : vector<64x128xbf16>, vector<128x128xbf16>, vector<64x128xf32> -> vector<64x128xf32>
    %12 = vector.broadcast %9 : vector<1x128xf32> to vector<64x128xf32>
    %13 = arith.addf %11, %12 : vector<64x128xf32>
    %cst_11 = arith.constant 0.000000e+00 : f32
    %14 = vector.broadcast %cst_11 : f32 to vector<64x128xf32>
    %15 = arith.maximumf %13, %14 : vector<64x128xf32>
    %c0_12 = arith.constant 0 : index
    %c0_13 = arith.constant 0 : index
    %16 = vector.load %arg6[%c0_12, %c0_13] : memref<128x128xbf16, #tpu.memory_space<vmem>>, vector<128x128xbf16>
    %c0_14 = arith.constant 0 : index
    %c0_15 = arith.constant 0 : index
    %17 = vector.load %arg7[%c0_14, %c0_15] : memref<1x128xf32, #tpu.memory_space<vmem>>, vector<1x128xf32>
    %18 = arith.truncf %15 : vector<64x128xf32> to vector<64x128xbf16>
    %cst_16 = arith.constant dense<0.000000e+00> : vector<64x128xf32>
    %19 = tpu.matmul %18, %16, %cst_16 {dimension_numbers = #tpu.dot_dimension_numbers<[1], [0], [0], [1], [0, 0, 1, 1], [], []>} : vector<64x128xbf16>, vector<128x128xbf16>, vector<64x128xf32> -> vector<64x128xf32>
    %20 = vector.broadcast %17 : vector<1x128xf32> to vector<64x128xf32>
    %21 = arith.addf %19, %20 : vector<64x128xf32>
    %c0_17 = arith.constant 0 : index
    %c0_18 = arith.constant 0 : index
    %22 = vector.load %arg8[%c0_17, %c0_18] : memref<64x128xf32, #tpu.memory_space<vmem>>, vector<64x128xf32>
    tpu.vector_store %arg8[%c0_17, %c0_18], %21 {strides = array<i32>} : memref<64x128xf32, #tpu.memory_space<vmem>>, vector<64x128xf32>,
    return
  }
  func.func @transform_0(%arg0: i32) -> (i32, i32) {
    %c0_i32 = arith.constant 0 : i32
    %c0_i32_0 = arith.constant 0 : i32
    return %arg0, %c0_i32 : i32, i32
  }
  func.func @transform_1(%arg0: i32) -> (i32, i32) {
    %c0_i32 = arith.constant 0 : i32
    %c0_i32_0 = arith.constant 0 : i32
    %c0_i32_1 = arith.constant 0 : i32
    return %c0_i32, %c0_i32_0 : i32, i32
  }
  func.func @transform_2(%arg0: i32) -> (i32, i32) {
    %c0_i32 = arith.constant 0 : i32
    %c0_i32_0 = arith.constant 0 : i32
    %c0_i32_1 = arith.constant 0 : i32
    return %c0_i32, %c0_i32_0 : i32, i32
  }
  func.func @transform_3(%arg0: i32) -> (i32, i32) {
    %c0_i32 = arith.constant 0 : i32
    %c0_i32_0 = arith.constant 0 : i32
    %c0_i32_1 = arith.constant 0 : i32
    return %c0_i32, %c0_i32_0 : i32, i32
  }
  func.func @transform_4(%arg0: i32) -> (i32, i32) {
    %c0_i32 = arith.constant 0 : i32
    %c0_i32_0 = arith.constant 0 : i32
    %c0_i32_1 = arith.constant 0 : i32
    return %c0_i32, %c0_i32_0 : i32, i32
  }
  func.func @transform_5(%arg0: i32) -> (i32, i32) {
    %c0_i32 = arith.constant 0 : i32
    %c0_i32_0 = arith.constant 0 : i32
    %c0_i32_1 = arith.constant 0 : i32
    return %c0_i32, %c0_i32_0 : i32, i32
  }
  func.func @transform_6(%arg0: i32) -> (i32, i32) {
    %c0_i32 = arith.constant 0 : i32
    %c0_i32_0 = arith.constant 0 : i32
    %c0_i32_1 = arith.constant 0 : i32
    return %c0_i32, %c0_i32_0 : i32, i32
  }
  func.func @transform_7(%arg0: i32) -> (i32, i32) {
    %c0_i32 = arith.constant 0 : i32
    %c0_i32_0 = arith.constant 0 : i32
    return %arg0, %c0_i32 : i32, i32
  }
}

</mosaic_0001>

<bundles_post_ra>
// kernel: feed_forward_network.1
= control target key start
LH: loop header
LB: loop body
LE: loop exit
PB: predicated region body
PF: predicated region fallthrough
CT: control target
= control target key end

     0   :  { %s1061_s24 = smov 0   ;;  %s1169_s0 = inlined_call_operand.vmem [shape: bf16[256,128], index: 0, kind: input, shape index: {}]   ;;  %s1170_s1 = inlined_call_operand.vmem [shape: bf16[128,128], index: 1, kind: input, shape index: {}]   ;;  %s1171_s2 = inlined_call_operand.vmem [shape: f32[1,128], index: 2, kind: input, shape index: {}]   ;;  %s1172_s3 = inlined_call_operand.vmem [shape: bf16[128,128], index: 3, kind: input, shape index: {}]   ;;  %s1173_s4 = inlined_call_operand.vmem [shape: f32[1,128], index: 4, kind: input, shape index: {}]   ;;  %s1174_s5 = inlined_call_operand.vmem [shape: bf16[128,128], index: 5, kind: input, shape index: {}]   ;;  %s1175_s6 = inlined_call_operand.vmem [shape: f32[1,128], index: 6, kind: input, shape index: {}]   ;;  %s1176_s7 = inlined_call_operand.vmem [shape: f32[256,128], index: 7, kind: output, shape index: {}]  }
   0x1 LB: > { %s811_s25 = sadd.s32 4294967295, %s1019_s24   ;;  %p815_p0 = scmp.ge.s32.totalorder %s1019_s24, 1  ;;  %s1019_s24 = sphi %s1061_s24, %s17_s24  }
   0x2   : > { %p238_p1 = scmp.lt.s32.totalorder %s1019_s24, 5 }
   0x4   : > { %p239_p2 = pnand %p815_p0, %p238_p1 }
   0x5   : > { %v985_v0 = vld [vmem:[%s1170_s1] sm:$0xff] (!%p239_p2)   ;;  %s816_s28 = sshll.u32 (!%p239_p2), %s811_s25, 3  ;;  %v986_v1 = vld [vmem:[%s1170_s1 + $0x8] sm:$0xff] (!%p239_p2)   ;;  %v987_v2 = vld [vmem:[%s1170_s1 + $0x10] sm:$0xff] (!%p239_p2)  }
   0x6   : > { %242 = sbr.rel (%p239_p2) target bundleno = 708 (0x2c4), region = 48  ;;  %p271_p3 = scmp.lt.s32.totalorder (!%p239_p2), %s816_s28, 31  ;;  %889 = vmatprep.subr.bf16.mxu0 (!%p239_p2), %v985_v0  ;;  %v988_v3 = vld [vmem:[%s1170_s1 + $0x18] sm:$0xff] (!%p239_p2)   ;;  %v989_v5 = vld [vmem:[%s1170_s1 + $0x20] sm:$0xff] (!%p239_p2)   ;;  %v998_v7 = vld [vmem:[%s1172_s3 + $0x8] sm:$0xff] (!%p239_p2)  }
   0x7   : > { %890 = vmatpush3.bf16.msra.mxu0 (!%p239_p2), %v985_v0  ;;  %v997_v6 = vld [vmem:[%s1172_s3] sm:$0xff] (!%p239_p2)   ;;  %v990_v8 = vld [vmem:[%s1170_s1 + $0x28] sm:$0xff] (!%p239_p2)   ;;  %v999_v9 = vld [vmem:[%s1172_s3 + $0x10] sm:$0xff] (!%p239_p2)  }
   0x8   : > { %891 = vmatprep.subr.bf16.mxu0 (!%p239_p2), %v986_v1  ;;  %913 = vmatprep.subr.bf16.mxu1 (!%p239_p2), %v997_v6  ;;  %v991_v10 = vld [vmem:[%s1170_s1 + $0x30] sm:$0xff] (!%p239_p2)   ;;  %v1000_v11 = vld [vmem:[%s1172_s3 + $0x18] sm:$0xff] (!%p239_p2)   ;;  %v1001_v13 = vld [vmem:[%s1172_s3 + $0x20] sm:$0xff] (!%p239_p2)  }
   0x9   : > { %914 = vmatpush3.bf16.msra.mxu1 (!%p239_p2), %v997_v6  ;;  %v992_v12 = vld [vmem:[%s1170_s1 + $0x38] sm:$0xff] (!%p239_p2)   ;;  %v1002_v14 = vld [vmem:[%s1172_s3 + $0x28] sm:$0xff] (!%p239_p2)   ;;  %v1003_v18 = vld [vmem:[%s1172_s3 + $0x30] sm:$0xff] (!%p239_p2)  }
   0xa   : > { %915 = vmatprep.subr.bf16.mxu1 (!%p239_p2), %v998_v7  ;;  %v1004_v19 = vld [vmem:[%s1172_s3 + $0x38] sm:$0xff] (!%p239_p2)   ;;  %v1005_v20 = vld [vmem:[%s1174_s5] sm:$0xff] (!%p239_p2)   ;;  %v1006_v21 = vld [vmem:[%s1174_s5 + $0x8] sm:$0xff] (!%p239_p2)  }
   0xb   : > { %892 = vmatpush3.bf16.msra.mxu0 (!%p239_p2), %v986_v1  ;;  %v1007_v22 = vld [vmem:[%s1174_s5 + $0x10] sm:$0xff] (!%p239_p2)   ;;  %v1008_v23 = vld [vmem:[%s1174_s5 + $0x18] sm:$0xff] (!%p239_p2)   ;;  %v1009_v24 = vld [vmem:[%s1174_s5 + $0x20] sm:$0xff] (!%p239_p2)  }
   0xc   : > { %893 = vmatprep.subr.bf16.mxu0 (!%p239_p2), %v987_v2  ;;  %v1010_v25 = vld [vmem:[%s1174_s5 + $0x28] sm:$0xff] (!%p239_p2)   ;;  %v820_v26 = vld [vmem:[%s1171_s2] ss:$0 sm:$0xff] (!%p239_p2)  ;;  %v1011_v55 = vld [vmem:[%s1174_s5 + $0x30] sm:$0xff] (!%p239_p2)  }
   0xd   : > { %s1178_s28 = smov (!%p271_p3, %s816_s28), 31  ;;  %916 = vmatpush3.bf16.msra.mxu1 %v998_v7  ;;  %v1012_v56 = vld [vmem:[%s1174_s5 + $0x38] sm:$0xff]   ;;  %v833_v57 = vld [vmem:[%s1173_s4] ss:$0 sm:$0xff] }
   0xe   : > { %s817_s10 = sshll.u32 %s1178_s28, 2  ;;  %917 = vmatprep.subr.bf16.mxu1 %v999_v9  ;;  %s819_s19 = sshll.u32 %s1178_s28, 3 }
   0xf   : > { %s1084_s13 = scalar_lea.vmem %s1169_s0, %s817_s10  ;;  %894 = vmatpush3.bf16.msra.mxu0 %v987_v2 }
  0x10   : > { %v993_v4 = vld [vmem:[%s1084_s13] sm:$0xff]   ;;  %895 = vmatprep.subr.bf16.mxu0 %v988_v3  ;;  %v994_v15 = vld [vmem:[%s1084_s13 + $0x8] sm:$0xff]   ;;  %v995_v16 = vld [vmem:[%s1084_s13 + $0x10] sm:$0xff]  }
  0x11   : > { %905 = vmatprep.mubr.bf16.mxu0 %v993_v4  ;;  %918 = vmatpush3.bf16.msra.mxu1 %v999_v9  ;;  %v996_v17 = vld [vmem:[%s1084_s13 + $0x18] sm:$0xff]   ;;  %s280_s13 = scalar_lea.vmem %s1176_s7, %s819_s19 }
  0x12   : > { %919 = vmatprep.subr.bf16.mxu1 %v1000_v11 }
  0x13   : > { %896 = vmatpush3.bf16.msra.mxu0 %v988_v3 }
  0x14   : > { %897 = vmatprep.subr.bf16.mxu0 %v989_v5 }
  0x15   : > { %920 = vmatpush3.bf16.msra.mxu1 %v1000_v11 }
  0x16   : > { %921 = vmatprep.subr.bf16.mxu1 %v1001_v13 }
  0x17   : > { %898 = vmatpush3.bf16.msra.mxu0 %v989_v5 }
  0x18   : > { %899 = vmatprep.subr.bf16.mxu0 %v990_v8 }
  0x19   : > { %922 = vmatpush3.bf16.msra.mxu1 %v1001_v13 }
  0x1a   : > { %923 = vmatprep.subr.bf16.mxu1 %v1002_v14 }
  0x1b   : > { %900 = vmatpush3.bf16.msra.mxu0 %v990_v8 }
  0x1c   : > { %901 = vmatprep.subr.bf16.mxu0 %v991_v10 }
  0x1d   : > { %924 = vmatpush3.bf16.msra.mxu1 %v1002_v14 }
  0x1e   : > { %925 = vmatprep.subr.bf16.mxu1 %v1003_v18 }
  0x1f   : > { %902 = vmatpush3.bf16.msra.mxu0 %v991_v10 }
  0x20   : > { %903 = vmatprep.subr.bf16.mxu0 %v992_v12 }
  0x21   : > { %926 = vmatpush3.bf16.msra.mxu1 %v1003_v18 }
  0x22   : > { %927 = vmatprep.subr.bf16.mxu1 %v1004_v19 }
  0x23   : > { %904 = vmatpush3.bf16.msra.mxu0 %v992_v12 }
  0x24   : > { %937 = vmatprep.subr.bf16.mxu0 %v1005_v20 }
  0x25   : > { %928 = vmatpush3.bf16.msra.mxu1 %v1004_v19 }
  0x26   : > { %906 = vmatmul.mubr.bf16.vlgmr.msra.gmra.mrb[0].mxu0 %v994_v15  ;;  %961 = vmatprep.subr.bf16.mxu1 %v1005_v20 }
  0x27   : > { %909 = vmatprep.mubr.bf16.mxu0 %v995_v16  ;;  %938 = vmatpush3.bf16.msra.mxu0 %v1005_v20 }
  0x28   : > { %939 = vmatprep.subr.bf16.mxu0 %v1006_v21 }
  0x2b   : > { %940 = vmatpush3.bf16.msra.mxu0 %v1006_v21 }
  0x2c   : > { %941 = vmatprep.subr.bf16.mxu0 %v1007_v22 }
  0x2e   : > { %910 = vmatmul.mubr.bf16.gmra.mrb[4].mxu0 %v996_v17 }
  0x2f   : > { %942 = vmatpush3.bf16.msra.mxu0 %v1007_v22 }
  0x30   : > { %943 = vmatprep.subr.bf16.mxu0 %v1008_v23 }
  0x33   : > { %944 = vmatpush3.bf16.msra.mxu0 %v1008_v23 }
  0x34   : > { %945 = vmatprep.subr.bf16.mxu0 %v1009_v24 }
  0x37   : > { %946 = vmatpush3.bf16.msra.mxu0 %v1009_v24 }
  0x38   : > { %947 = vmatprep.subr.bf16.mxu0 %v1010_v25 }
  0x3b   : > { %948 = vmatpush3.bf16.msra.mxu0 %v1010_v25 }
  0x3c   : > { %949 = vmatprep.subr.bf16.mxu0 %v1011_v55 }
  0x3f   : > { %950 = vmatpush3.bf16.msra.mxu0 %v1011_v55 }
  0x40   : > { %951 = vmatprep.subr.bf16.mxu0 %v1012_v56 }
  0x43   : > { %952 = vmatpush3.bf16.msra.mxu0 %v1012_v56 }
  0xf9   : > { %v907_v27 = vpop.f32.mrb[0].mxu0 }
  0xfa   : > { %v429_v28 = vadd.f32 %v907_v27, %v820_v26  ;;  %v420_v29 = vpop.f32.mrb[1].mxu0 }
  0xfb   : > { %v421_v30 = vadd.f32 %v820_v26, %v420_v29  ;;  %v908_v31 = vpop.f32.mrb[2].mxu0 }
  0xfc   : > { %v432_v32 = vadd.f32 %v908_v31, %v820_v26  ;;  %v423_v33 = vpop.f32.mrb[3].mxu0  ;;  %v453_v35 = vmax.f32 %v429_v28, 0.0 }
  0xfd   : > { %v424_v34 = vadd.f32 %v820_v26, %v423_v33  ;;  %v451_v37 = vmax.f32 %v421_v30, 0.0 }
  0xfe   : > { %v454_v36 = vmax.f32 %v432_v32, 0.0 }
  0xff   : > { %v452_v38 = vmax.f32 %v424_v34, 0.0 }
 0x100   : > { %v477_v39 = vpack.c.bf16 %v454_v36, %v453_v35 }
 0x101   : > { %v911_v40 = vpop.f32.mrb[4].mxu0  ;;  %v476_v41 = vpack.c.bf16 %v452_v38, %v451_v37 }
 0x102   : > { %v445_v42 = vadd.f32 %v911_v40, %v820_v26  ;;  %v436_v43 = vpop.f32.mrb[5].mxu0 }
 0x103   : > { %v437_v44 = vadd.f32 %v820_v26, %v436_v43  ;;  %v912_v45 = vpop.f32.mrb[6].mxu0  ;;  %929 = vmatprep.mubr.bf16.mxu1 %v476_v41 }
 0x104   : > { %v448_v46 = vadd.f32 %v912_v45, %v820_v26  ;;  %v439_v47 = vpop.f32.mrb[7].mxu0  ;;  %930 = vmatmul.mubr.bf16.vlgmr.msra.gmra.mrb[0].mxu1 %v477_v39  ;;  %v457_v49 = vmax.f32 %v445_v42, 0.0 }
 0x105   : > { %v440_v48 = vadd.f32 %v820_v26, %v439_v47  ;;  %969 = vmatpush3.bf16.msra.mxu1 %v1005_v20  ;;  %v455_v51 = vmax.f32 %v437_v44, 0.0 }
 0x106   : > { %v458_v50 = vmax.f32 %v448_v46, 0.0  ;;  %962 = vmatprep.subr.bf16.mxu1 %v1006_v21 }
 0x107   : > { %v456_v52 = vmax.f32 %v440_v48, 0.0 }
 0x108   : > { %v479_v53 = vpack.c.bf16 %v458_v50, %v457_v49 }
 0x109   : > { %v478_v54 = vpack.c.bf16 %v456_v52, %v455_v51  ;;  %970 = vmatpush3.bf16.msra.mxu1 %v1006_v21 }
 0x10a   : > { %963 = vmatprep.subr.bf16.mxu1 %v1007_v22 }
 0x10b   : > { %933 = vmatprep.mubr.bf16.mxu1 %v478_v54 }
 0x10c   : > { %934 = vmatmul.mubr.bf16.gmra.mrb[4].mxu1 %v479_v53 }
 0x10d   : > { %971 = vmatpush3.bf16.msra.mxu1 %v1007_v22  ;;  %v842_v22 = vld [vmem:[%s1175_s6] ss:$0 sm:$0xff] }
 0x10e   : > { %964 = vmatprep.subr.bf16.mxu1 %v1008_v23 }
 0x111   : > { %972 = vmatpush3.bf16.msra.mxu1 %v1008_v23 }
 0x112   : > { %965 = vmatprep.subr.bf16.mxu1 %v1009_v24 }
 0x115   : > { %973 = vmatpush3.bf16.msra.mxu1 %v1009_v24 }
 0x116   : > { %966 = vmatprep.subr.bf16.mxu1 %v1010_v25 }
 0x119   : > { %974 = vmatpush3.bf16.msra.mxu1 %v1010_v25 }
 0x11a   : > { %967 = vmatprep.subr.bf16.mxu1 %v1011_v55 }
 0x11d   : > { %975 = vmatpush3.bf16.msra.mxu1 %v1011_v55 }
 0x11e   : > { %968 = vmatprep.subr.bf16.mxu1 %v1012_v56 }
 0x121   : > { %976 = vmatpush3.bf16.msra.mxu1 %v1012_v56 }
 0x1d7   : > { %v931_v58 = vpop.f32.mrb[0].mxu1 }
 0x1d8   : > { %v577_v59 = vadd.f32 %v931_v58, %v833_v57  ;;  %v568_v60 = vpop.f32.mrb[1].mxu1 }
 0x1d9   : > { %v569_v61 = vadd.f32 %v833_v57, %v568_v60  ;;  %v932_v62 = vpop.f32.mrb[2].mxu1 }
 0x1da   : > { %v580_v63 = vadd.f32 %v932_v62, %v833_v57  ;;  %v571_v0 = vpop.f32.mrb[3].mxu1  ;;  %v601_v2 = vmax.f32 %v577_v59, 0.0 }
 0x1db   : > { %v572_v1 = vadd.f32 %v833_v57, %v571_v0  ;;  %v599_v4 = vmax.f32 %v569_v61, 0.0 }
 0x1dc   : > { %v602_v3 = vmax.f32 %v580_v63, 0.0 }
 0x1dd   : > { %v600_v5 = vmax.f32 %v572_v1, 0.0 }
 0x1de   : > { %v625_v6 = vpack.c.bf16 %v602_v3, %v601_v2 }
 0x1df   : > { %v624_v7 = vpack.c.bf16 %v600_v5, %v599_v4  ;;  %v935_v8 = vpop.f32.mrb[4].mxu1 }
 0x1e0   : > { %v593_v9 = vadd.f32 %v935_v8, %v833_v57  ;;  %v584_v10 = vpop.f32.mrb[5].mxu1 }
 0x1e1   : > { %v585_v11 = vadd.f32 %v833_v57, %v584_v10  ;;  %v936_v12 = vpop.f32.mrb[6].mxu1  ;;  %953 = vmatprep.mubr.bf16.mxu0 %v624_v7 }
 0x1e2   : > { %v596_v13 = vadd.f32 %v936_v12, %v833_v57  ;;  %v587_v14 = vpop.f32.mrb[7].mxu1  ;;  %954 = vmatmul.mubr.bf16.vlgmr.msra.gmra.mrb[8].mxu0 %v625_v6  ;;  %v605_v16 = vmax.f32 %v593_v9, 0.0 }
 0x1e3   : > { %v588_v15 = vadd.f32 %v833_v57, %v587_v14  ;;  %v603_v18 = vmax.f32 %v585_v11, 0.0 }
 0x1e4   : > { %v606_v17 = vmax.f32 %v596_v13, 0.0 }
 0x1e5   : > { %v604_v19 = vmax.f32 %v588_v15, 0.0 }
 0x1e6   : > { %v627_v20 = vpack.c.bf16 %v606_v17, %v605_v16 }
 0x1e7   : > { %v626_v21 = vpack.c.bf16 %v604_v19, %v603_v18 }
 0x1e9   : > { %957 = vmatprep.mubr.bf16.mxu1 %v626_v21 }
 0x1ea   : > { %958 = vmatmul.mubr.bf16.vlgmr.msra.gmra.mrb[8].mxu1 %v627_v20 }
 0x2b5   : > { %v955_v23 = vpop.f32.mrb[8].mxu0 }
 0x2b6   : > { %v725_v24 = vadd.f32 %v955_v23, %v842_v22  ;;  %v716_v25 = vpop.f32.mrb[9].mxu0 }
 0x2b7   : > { %v717_v26 = vadd.f32 %v842_v22, %v716_v25  ;;  %v956_v27 = vpop.f32.mrb[10].mxu0 }
 0x2b8   : > { %749 = vst [vmem:[%s280_s13 + $0x10] sm:$0xff] %v725_v24  ;;  %v728_v28 = vadd.f32 %v956_v27, %v842_v22  ;;  %v719_v29 = vpop.f32.mrb[11].mxu0 }
 0x2b9   : > { %747 = vst [vmem:[%s280_s13] sm:$0xff] %v717_v26  ;;  %v720_v30 = vadd.f32 %v842_v22, %v719_v29 }
 0x2ba   : > { %750 = vst [vmem:[%s280_s13 + $0x18] sm:$0xff] %v728_v28 }
 0x2bb   : > { %748 = vst [vmem:[%s280_s13 + $0x8] sm:$0xff] %v720_v30 }
 0x2bd   : > { %v959_v31 = vpop.f32.mrb[8].mxu1 }
 0x2be   : > { %v741_v32 = vadd.f32 %v959_v31, %v842_v22  ;;  %v732_v33 = vpop.f32.mrb[9].mxu1 }
 0x2bf   : > { %v733_v34 = vadd.f32 %v842_v22, %v732_v33  ;;  %v960_v35 = vpop.f32.mrb[10].mxu1 }
 0x2c0   : > { %753 = vst [vmem:[%s280_s13 + $0x30] sm:$0xff] %v741_v32  ;;  %v744_v36 = vadd.f32 %v960_v35, %v842_v22  ;;  %v735_v37 = vpop.f32.mrb[11].mxu1 }
 0x2c1   : > { %751 = vst [vmem:[%s280_s13 + $0x20] sm:$0xff] %v733_v34  ;;  %v736_v38 = vadd.f32 %v842_v22, %v735_v37 }
 0x2c2   : > { %754 = vst [vmem:[%s280_s13 + $0x38] sm:$0xff] %v744_v36 }
 0x2c3   : > { %752 = vst [vmem:[%s280_s13 + $0x28] sm:$0xff] %v736_v38 }
 0x2c4 PF: > { %s17_s24 = sadd.s32 1, %s1019_s24  }
 0x2c5   : > { %p14_p4 = scmp.ge.s32.totalorder %s17_s24, 6  }
 0x2c7   :  { %16 = sbr.rel (!%p14_p4) target bundleno = 1 (0x1), region = 78 }

// kernel: feed_forward_network.1
= control target key start
LH: loop header
LB: loop body
LE: loop exit
PB: predicated region body
PF: predicated region fallthrough
CT: control target
= control target key end

     0   :  { %s1061_s24 = smov 0   ;;  %s1169_s0 = inlined_call_operand.vmem [shape: bf16[256,128], index: 0, kind: input, shape index: {}]   ;;  %s1170_s1 = inlined_call_operand.vmem [shape: bf16[128,128], index: 1, kind: input, shape index: {}]   ;;  %s1171_s2 = inlined_call_operand.vmem [shape: f32[1,128], index: 2, kind: input, shape index: {}]   ;;  %s1172_s3 = inlined_call_operand.vmem [shape: bf16[128,128], index: 3, kind: input, shape index: {}]   ;;  %s1173_s4 = inlined_call_operand.vmem [shape: f32[1,128], index: 4, kind: input, shape index: {}]   ;;  %s1174_s5 = inlined_call_operand.vmem [shape: bf16[128,128], index: 5, kind: input, shape index: {}]   ;;  %s1175_s6 = inlined_call_operand.vmem [shape: f32[1,128], index: 6, kind: input, shape index: {}]   ;;  %s1176_s7 = inlined_call_operand.vmem [shape: f32[256,128], index: 7, kind: output, shape index: {}]  }
   0x1 LB: > { %s811_s25 = sadd.s32 4294967295, %s1019_s24   ;;  %p815_p0 = scmp.ge.s32.totalorder %s1019_s24, 1  ;;  %s1019_s24 = sphi %s1061_s24, %s17_s24  }
   0x2   : > { %p238_p1 = scmp.lt.s32.totalorder %s1019_s24, 5 }
   0x4   : > { %p239_p2 = pnand %p815_p0, %p238_p1 }
   0x5   : > { %v985_v0 = vld [vmem:[%s1170_s1] sm:$0xff] (!%p239_p2)   ;;  %s816_s28 = sshll.u32 (!%p239_p2), %s811_s25, 3  ;;  %v986_v1 = vld [vmem:[%s1170_s1 + $0x8] sm:$0xff] (!%p239_p2)   ;;  %v987_v2 = vld [vmem:[%s1170_s1 + $0x10] sm:$0xff] (!%p239_p2)  }
   0x6   : > { %242 = sbr.rel (%p239_p2) target bundleno = 708 (0x2c4), region = 48  ;;  %p271_p3 = scmp.lt.s32.totalorder (!%p239_p2), %s816_s28, 31  ;;  %889 = vmatprep.subr.bf16.mxu0 (!%p239_p2), %v985_v0  ;;  %v988_v3 = vld [vmem:[%s1170_s1 + $0x18] sm:$0xff] (!%p239_p2)   ;;  %v989_v5 = vld [vmem:[%s1170_s1 + $0x20] sm:$0xff] (!%p239_p2)   ;;  %v998_v7 = vld [vmem:[%s1172_s3 + $0x8] sm:$0xff] (!%p239_p2)  }
   0x7   : > { %890 = vmatpush3.bf16.msra.mxu0 (!%p239_p2), %v985_v0  ;;  %v997_v6 = vld [vmem:[%s1172_s3] sm:$0xff] (!%p239_p2)   ;;  %v990_v8 = vld [vmem:[%s1170_s1 + $0x28] sm:$0xff] (!%p239_p2)   ;;  %v999_v9 = vld [vmem:[%s1172_s3 + $0x10] sm:$0xff] (!%p239_p2)  }
   0x8   : > { %891 = vmatprep.subr.bf16.mxu0 (!%p239_p2), %v986_v1  ;;  %913 = vmatprep.subr.bf16.mxu1 (!%p239_p2), %v997_v6  ;;  %v991_v10 = vld [vmem:[%s1170_s1 + $0x30] sm:$0xff] (!%p239_p2)   ;;  %v1000_v11 = vld [vmem:[%s1172_s3 + $0x18] sm:$0xff] (!%p239_p2)   ;;  %v1001_v13 = vld [vmem:[%s1172_s3 + $0x20] sm:$0xff] (!%p239_p2)  }
   0x9   : > { %914 = vmatpush3.bf16.msra.mxu1 (!%p239_p2), %v997_v6  ;;  %v992_v12 = vld [vmem:[%s1170_s1 + $0x38] sm:$0xff] (!%p239_p2)   ;;  %v1002_v14 = vld [vmem:[%s1172_s3 + $0x28] sm:$0xff] (!%p239_p2)   ;;  %v1003_v18 = vld [vmem:[%s1172_s3 + $0x30] sm:$0xff] (!%p239_p2)  }
   0xa   : > { %915 = vmatprep.subr.bf16.mxu1 (!%p239_p2), %v998_v7  ;;  %v1004_v19 = vld [vmem:[%s1172_s3 + $0x38] sm:$0xff] (!%p239_p2)   ;;  %v1005_v20 = vld [vmem:[%s1174_s5] sm:$0xff] (!%p239_p2)   ;;  %v1006_v21 = vld [vmem:[%s1174_s5 + $0x8] sm:$0xff] (!%p239_p2)  }
   0xb   : > { %892 = vmatpush3.bf16.msra.mxu0 (!%p239_p2), %v986_v1  ;;  %v1007_v22 = vld [vmem:[%s1174_s5 + $0x10] sm:$0xff] (!%p239_p2)   ;;  %v1008_v23 = vld [vmem:[%s1174_s5 + $0x18] sm:$0xff] (!%p239_p2)   ;;  %v1009_v24 = vld [vmem:[%s1174_s5 + $0x20] sm:$0xff] (!%p239_p2)  }
   0xc   : > { %893 = vmatprep.subr.bf16.mxu0 (!%p239_p2), %v987_v2  ;;  %v1010_v25 = vld [vmem:[%s1174_s5 + $0x28] sm:$0xff] (!%p239_p2)   ;;  %v820_v26 = vld [vmem:[%s1171_s2] ss:$0 sm:$0xff] (!%p239_p2)  ;;  %v1011_v55 = vld [vmem:[%s1174_s5 + $0x30] sm:$0xff] (!%p239_p2)  }
   0xd   : > { %s1178_s28 = smov (!%p271_p3, %s816_s28), 31  ;;  %916 = vmatpush3.bf16.msra.mxu1 %v998_v7  ;;  %v1012_v56 = vld [vmem:[%s1174_s5 + $0x38] sm:$0xff]   ;;  %v833_v57 = vld [vmem:[%s1173_s4] ss:$0 sm:$0xff] }
   0xe   : > { %s817_s10 = sshll.u32 %s1178_s28, 2  ;;  %917 = vmatprep.subr.bf16.mxu1 %v999_v9  ;;  %s819_s19 = sshll.u32 %s1178_s28, 3 }
   0xf   : > { %s1084_s13 = scalar_lea.vmem %s1169_s0, %s817_s10  ;;  %894 = vmatpush3.bf16.msra.mxu0 %v987_v2 }
  0x10   : > { %v993_v4 = vld [vmem:[%s1084_s13] sm:$0xff]   ;;  %895 = vmatprep.subr.bf16.mxu0 %v988_v3  ;;  %v994_v15 = vld [vmem:[%s1084_s13 + $0x8] sm:$0xff]   ;;  %v995_v16 = vld [vmem:[%s1084_s13 + $0x10] sm:$0xff]  }
  0x11   : > { %905 = vmatprep.mubr.bf16.mxu0 %v993_v4  ;;  %918 = vmatpush3.bf16.msra.mxu1 %v999_v9  ;;  %v996_v17 = vld [vmem:[%s1084_s13 + $0x18] sm:$0xff]   ;;  %s280_s13 = scalar_lea.vmem %s1176_s7, %s819_s19 }
  0x12   : > { %919 = vmatprep.subr.bf16.mxu1 %v1000_v11 }
  0x13   : > { %896 = vmatpush3.bf16.msra.mxu0 %v988_v3 }
  0x14   : > { %897 = vmatprep.subr.bf16.mxu0 %v989_v5 }
  0x15   : > { %920 = vmatpush3.bf16.msra.mxu1 %v1000_v11 }
  0x16   : > { %921 = vmatprep.subr.bf16.mxu1 %v1001_v13 }
  0x17   : > { %898 = vmatpush3.bf16.msra.mxu0 %v989_v5 }
  0x18   : > { %899 = vmatprep.subr.bf16.mxu0 %v990_v8 }
  0x19   : > { %922 = vmatpush3.bf16.msra.mxu1 %v1001_v13 }
  0x1a   : > { %923 = vmatprep.subr.bf16.mxu1 %v1002_v14 }
  0x1b   : > { %900 = vmatpush3.bf16.msra.mxu0 %v990_v8 }
  0x1c   : > { %901 = vmatprep.subr.bf16.mxu0 %v991_v10 }
  0x1d   : > { %924 = vmatpush3.bf16.msra.mxu1 %v1002_v14 }
  0x1e   : > { %925 = vmatprep.subr.bf16.mxu1 %v1003_v18 }
  0x1f   : > { %902 = vmatpush3.bf16.msra.mxu0 %v991_v10 }
  0x20   : > { %903 = vmatprep.subr.bf16.mxu0 %v992_v12 }
  0x21   : > { %926 = vmatpush3.bf16.msra.mxu1 %v1003_v18 }
  0x22   : > { %927 = vmatprep.subr.bf16.mxu1 %v1004_v19 }
  0x23   : > { %904 = vmatpush3.bf16.msra.mxu0 %v992_v12 }
  0x24   : > { %937 = vmatprep.subr.bf16.mxu0 %v1005_v20 }
  0x25   : > { %928 = vmatpush3.bf16.msra.mxu1 %v1004_v19 }
  0x26   : > { %906 = vmatmul.mubr.bf16.vlgmr.msra.gmra.mrb[0].mxu0 %v994_v15  ;;  %961 = vmatprep.subr.bf16.mxu1 %v1005_v20 }
  0x27   : > { %909 = vmatprep.mubr.bf16.mxu0 %v995_v16  ;;  %938 = vmatpush3.bf16.msra.mxu0 %v1005_v20 }
  0x28   : > { %939 = vmatprep.subr.bf16.mxu0 %v1006_v21 }
  0x2b   : > { %940 = vmatpush3.bf16.msra.mxu0 %v1006_v21 }
  0x2c   : > { %941 = vmatprep.subr.bf16.mxu0 %v1007_v22 }
  0x2e   : > { %910 = vmatmul.mubr.bf16.gmra.mrb[4].mxu0 %v996_v17 }
  0x2f   : > { %942 = vmatpush3.bf16.msra.mxu0 %v1007_v22 }
  0x30   : > { %943 = vmatprep.subr.bf16.mxu0 %v1008_v23 }
  0x33   : > { %944 = vmatpush3.bf16.msra.mxu0 %v1008_v23 }
  0x34   : > { %945 = vmatprep.subr.bf16.mxu0 %v1009_v24 }
  0x37   : > { %946 = vmatpush3.bf16.msra.mxu0 %v1009_v24 }
  0x38   : > { %947 = vmatprep.subr.bf16.mxu0 %v1010_v25 }
  0x3b   : > { %948 = vmatpush3.bf16.msra.mxu0 %v1010_v25 }
  0x3c   : > { %949 = vmatprep.subr.bf16.mxu0 %v1011_v55 }
  0x3f   : > { %950 = vmatpush3.bf16.msra.mxu0 %v1011_v55 }
  0x40   : > { %951 = vmatprep.subr.bf16.mxu0 %v1012_v56 }
  0x43   : > { %952 = vmatpush3.bf16.msra.mxu0 %v1012_v56 }
  0xf9   : > { %v907_v27 = vpop.f32.mrb[0].mxu0 }
  0xfa   : > { %v429_v28 = vadd.f32 %v907_v27, %v820_v26  ;;  %v420_v29 = vpop.f32.mrb[1].mxu0 }
  0xfb   : > { %v421_v30 = vadd.f32 %v820_v26, %v420_v29  ;;  %v908_v31 = vpop.f32.mrb[2].mxu0 }
  0xfc   : > { %v432_v32 = vadd.f32 %v908_v31, %v820_v26  ;;  %v423_v33 = vpop.f32.mrb[3].mxu0  ;;  %v453_v35 = vmax.f32 %v429_v28, 0.0 }
  0xfd   : > { %v424_v34 = vadd.f32 %v820_v26, %v423_v33  ;;  %v451_v37 = vmax.f32 %v421_v30, 0.0 }
  0xfe   : > { %v454_v36 = vmax.f32 %v432_v32, 0.0 }
  0xff   : > { %v452_v38 = vmax.f32 %v424_v34, 0.0 }
 0x100   : > { %v477_v39 = vpack.c.bf16 %v454_v36, %v453_v35 }
 0x101   : > { %v911_v40 = vpop.f32.mrb[4].mxu0  ;;  %v476_v41 = vpack.c.bf16 %v452_v38, %v451_v37 }
 0x102   : > { %v445_v42 = vadd.f32 %v911_v40, %v820_v26  ;;  %v436_v43 = vpop.f32.mrb[5].mxu0 }
 0x103   : > { %v437_v44 = vadd.f32 %v820_v26, %v436_v43  ;;  %v912_v45 = vpop.f32.mrb[6].mxu0  ;;  %929 = vmatprep.mubr.bf16.mxu1 %v476_v41 }
 0x104   : > { %v448_v46 = vadd.f32 %v912_v45, %v820_v26  ;;  %v439_v47 = vpop.f32.mrb[7].mxu0  ;;  %930 = vmatmul.mubr.bf16.vlgmr.msra.gmra.mrb[0].mxu1 %v477_v39  ;;  %v457_v49 = vmax.f32 %v445_v42, 0.0 }
 0x105   : > { %v440_v48 = vadd.f32 %v820_v26, %v439_v47  ;;  %969 = vmatpush3.bf16.msra.mxu1 %v1005_v20  ;;  %v455_v51 = vmax.f32 %v437_v44, 0.0 }
 0x106   : > { %v458_v50 = vmax.f32 %v448_v46, 0.0  ;;  %962 = vmatprep.subr.bf16.mxu1 %v1006_v21 }
 0x107   : > { %v456_v52 = vmax.f32 %v440_v48, 0.0 }
 0x108   : > { %v479_v53 = vpack.c.bf16 %v458_v50, %v457_v49 }
 0x109   : > { %v478_v54 = vpack.c.bf16 %v456_v52, %v455_v51  ;;  %970 = vmatpush3.bf16.msra.mxu1 %v1006_v21 }
 0x10a   : > { %963 = vmatprep.subr.bf16.mxu1 %v1007_v22 }
 0x10b   : > { %933 = vmatprep.mubr.bf16.mxu1 %v478_v54 }
 0x10c   : > { %934 = vmatmul.mubr.bf16.gmra.mrb[4].mxu1 %v479_v53 }
 0x10d   : > { %971 = vmatpush3.bf16.msra.mxu1 %v1007_v22  ;;  %v842_v22 = vld [vmem:[%s1175_s6] ss:$0 sm:$0xff] }
 0x10e   : > { %964 = vmatprep.subr.bf16.mxu1 %v1008_v23 }
 0x111   : > { %972 = vmatpush3.bf16.msra.mxu1 %v1008_v23 }
 0x112   : > { %965 = vmatprep.subr.bf16.mxu1 %v1009_v24 }
 0x115   : > { %973 = vmatpush3.bf16.msra.mxu1 %v1009_v24 }
 0x116   : > { %966 = vmatprep.subr.bf16.mxu1 %v1010_v25 }
 0x119   : > { %974 = vmatpush3.bf16.msra.mxu1 %v1010_v25 }
 0x11a   : > { %967 = vmatprep.subr.bf16.mxu1 %v1011_v55 }
 0x11d   : > { %975 = vmatpush3.bf16.msra.mxu1 %v1011_v55 }
 0x11e   : > { %968 = vmatprep.subr.bf16.mxu1 %v1012_v56 }
 0x121   : > { %976 = vmatpush3.bf16.msra.mxu1 %v1012_v56 }
 0x1d7   : > { %v931_v58 = vpop.f32.mrb[0].mxu1 }
 0x1d8   : > { %v577_v59 = vadd.f32 %v931_v58, %v833_v57  ;;  %v568_v60 = vpop.f32.mrb[1].mxu1 }
 0x1d9   : > { %v569_v61 = vadd.f32 %v833_v57, %v568_v60  ;;  %v932_v62 = vpop.f32.mrb[2].mxu1 }
 0x1da   : > { %v580_v63 = vadd.f32 %v932_v62, %v833_v57  ;;  %v571_v0 = vpop.f32.mrb[3].mxu1  ;;  %v601_v2 = vmax.f32 %v577_v59, 0.0 }
 0x1db   : > { %v572_v1 = vadd.f32 %v833_v57, %v571_v0  ;;  %v599_v4 = vmax.f32 %v569_v61, 0.0 }
 0x1dc   : > { %v602_v3 = vmax.f32 %v580_v63, 0.0 }
 0x1dd   : > { %v600_v5 = vmax.f32 %v572_v1, 0.0 }
 0x1de   : > { %v625_v6 = vpack.c.bf16 %v602_v3, %v601_v2 }
 0x1df   : > { %v624_v7 = vpack.c.bf16 %v600_v5, %v599_v4  ;;  %v935_v8 = vpop.f32.mrb[4].mxu1 }
 0x1e0   : > { %v593_v9 = vadd.f32 %v935_v8, %v833_v57  ;;  %v584_v10 = vpop.f32.mrb[5].mxu1 }
 0x1e1   : > { %v585_v11 = vadd.f32 %v833_v57, %v584_v10  ;;  %v936_v12 = vpop.f32.mrb[6].mxu1  ;;  %953 = vmatprep.mubr.bf16.mxu0 %v624_v7 }
 0x1e2   : > { %v596_v13 = vadd.f32 %v936_v12, %v833_v57  ;;  %v587_v14 = vpop.f32.mrb[7].mxu1  ;;  %954 = vmatmul.mubr.bf16.vlgmr.msra.gmra.mrb[8].mxu0 %v625_v6  ;;  %v605_v16 = vmax.f32 %v593_v9, 0.0 }
 0x1e3   : > { %v588_v15 = vadd.f32 %v833_v57, %v587_v14  ;;  %v603_v18 = vmax.f32 %v585_v11, 0.0 }
 0x1e4   : > { %v606_v17 = vmax.f32 %v596_v13, 0.0 }
 0x1e5   : > { %v604_v19 = vmax.f32 %v588_v15, 0.0 }
 0x1e6   : > { %v627_v20 = vpack.c.bf16 %v606_v17, %v605_v16 }
 0x1e7   : > { %v626_v21 = vpack.c.bf16 %v604_v19, %v603_v18 }
 0x1e9   : > { %957 = vmatprep.mubr.bf16.mxu1 %v626_v21 }
 0x1ea   : > { %958 = vmatmul.mubr.bf16.vlgmr.msra.gmra.mrb[8].mxu1 %v627_v20 }
 0x2b5   : > { %v955_v23 = vpop.f32.mrb[8].mxu0 }
 0x2b6   : > { %v725_v24 = vadd.f32 %v955_v23, %v842_v22  ;;  %v716_v25 = vpop.f32.mrb[9].mxu0 }
 0x2b7   : > { %v717_v26 = vadd.f32 %v842_v22, %v716_v25  ;;  %v956_v27 = vpop.f32.mrb[10].mxu0 }
 0x2b8   : > { %749 = vst [vmem:[%s280_s13 + $0x10] sm:$0xff] %v725_v24  ;;  %v728_v28 = vadd.f32 %v956_v27, %v842_v22  ;;  %v719_v29 = vpop.f32.mrb[11].mxu0 }
 0x2b9   : > { %747 = vst [vmem:[%s280_s13] sm:$0xff] %v717_v26  ;;  %v720_v30 = vadd.f32 %v842_v22, %v719_v29 }
 0x2ba   : > { %750 = vst [vmem:[%s280_s13 + $0x18] sm:$0xff] %v728_v28 }
 0x2bb   : > { %748 = vst [vmem:[%s280_s13 + $0x8] sm:$0xff] %v720_v30 }
 0x2bd   : > { %v959_v31 = vpop.f32.mrb[8].mxu1 }
 0x2be   : > { %v741_v32 = vadd.f32 %v959_v31, %v842_v22  ;;  %v732_v33 = vpop.f32.mrb[9].mxu1 }
 0x2bf   : > { %v733_v34 = vadd.f32 %v842_v22, %v732_v33  ;;  %v960_v35 = vpop.f32.mrb[10].mxu1 }
 0x2c0   : > { %753 = vst [vmem:[%s280_s13 + $0x30] sm:$0xff] %v741_v32  ;;  %v744_v36 = vadd.f32 %v960_v35, %v842_v22  ;;  %v735_v37 = vpop.f32.mrb[11].mxu1 }
 0x2c1   : > { %751 = vst [vmem:[%s280_s13 + $0x20] sm:$0xff] %v733_v34  ;;  %v736_v38 = vadd.f32 %v842_v22, %v735_v37 }
 0x2c2   : > { %754 = vst [vmem:[%s280_s13 + $0x38] sm:$0xff] %v744_v36 }
 0x2c3   : > { %752 = vst [vmem:[%s280_s13 + $0x28] sm:$0xff] %v736_v38 }
 0x2c4 PF: > { %s17_s24 = sadd.s32 1, %s1019_s24  }
 0x2c5   : > { %p14_p4 = scmp.ge.s32.totalorder %s17_s24, 6  }
 0x2c7   :  { %16 = sbr.rel (!%p14_p4) target bundleno = 1 (0x1), region = 78 }

</bundles_post_ra>
